<compile_context>
chip_gen: v7x
topology: tpu7x:2x2x1
jax: 0.10.0
libtpu: 0.0.40
codegen_flags: <defaults>
</compile_context>

<pallas_src>
import functools

import jax
import jax.numpy as jnp
from jax.experimental import pallas as pl
from jax.experimental.pallas import tpu as pltpu


def _reduce_stats_kernel(
    x_ref,        # (C, HW_T) VMEM  input tile (N dim squeezed)
    rmean_ref,    # (C, 1)    VMEM  running mean buffer
    rvar_ref,     # (C, 1)    VMEM  running var buffer
    rcount_ref,   # (1,)      SMEM  running count buffer
    mean_out,     # (C, 1)    VMEM  updated running mean
    var_out,      # (C, 1)    VMEM  updated running var
    inv_out,      # (C, 1)    VMEM  1 / sqrt(max(var, 0.01))
    acc_mean,     # (C, 1)    VMEM  scratch: merged mean so far
    acc_m2,       # (C, 1)    VMEM  scratch: merged M2 so far
    *,
    tile_elems: float,
    total_elems: float,
    n_batch: float,
):
    i = pl.program_id(0)
    j = pl.program_id(1)
    n_j = pl.num_programs(1)
    step = i * n_j + j
    last_step = pl.num_programs(0) * n_j - 1

    @pl.when(step == 0)
    def _():
        acc_mean[...] = jnp.zeros_like(acc_mean)
        acc_m2[...] = jnp.zeros_like(acc_m2)

    # Per-tile statistics; the x tile is read from HBM once and reused from VMEM.
    x = x_ref[...]
    tile_n = jnp.float32(tile_elems)
    tile_mean = jnp.sum(x, axis=1, keepdims=True) / tile_n          # (C, 1)
    d = x - tile_mean
    tile_m2 = jnp.sum(d * d, axis=1, keepdims=True)                  # (C, 1)

    # Chan parallel merge of (tile_mean, tile_m2, tile_n) into the accumulators.
    cnt_a = step.astype(jnp.float32) * tile_n                        # elems merged so far
    tot = cnt_a + tile_n
    delta = tile_mean - acc_mean[...]
    acc_m2[...] = acc_m2[...] + tile_m2 + delta * delta * (cnt_a * tile_n / tot)
    acc_mean[...] = acc_mean[...] + delta * (tile_n / tot)

    # Finalize: merge batch stats with the running buffers (same Chan formula as the
    # PyTorch module) and emit the per-channel reciprocal stdev for pass 2.
    @pl.when(step == last_step)
    def _():
        new_mean = acc_mean[...]
        new_var = acc_m2[...] / jnp.float32(total_elems)
        new_count = jnp.float32(n_batch)
        cnt_old = rcount_ref[0]
        tot2 = cnt_old + new_count
        m_a = rvar_ref[...] * cnt_old
        m_b = new_var * new_count
        dlt = new_mean - rmean_ref[...]
        m2 = m_a + m_b + dlt * dlt * (cnt_old * new_count / tot2)
        var_u = m2 / tot2
        mean_u = (cnt_old * rmean_ref[...] + new_count * new_mean) / tot2
        mean_out[...] = mean_u
        var_out[...] = var_u
        inv_out[...] = jax.lax.rsqrt(jnp.maximum(var_u, jnp.float32(0.01)))


def _normalize_kernel(x_ref, mean_ref, inv_ref, y_ref):
    # (C, HW_T) tile: subtract per-channel mean, multiply by per-channel 1/stdev.
    y_ref[...] = (x_ref[...] - mean_ref[...]) * inv_ref[...]


def _pick_hw_tile(hw: int, c: int, max_block_bytes: int = 2 * 1024 * 1024) -> int:
    """Largest lane-dense (multiple-of-128) tile of the HW axis that divides hw and
    keeps a (C, hw_tile) f32 block under max_block_bytes.  Falls back to the full
    extent (always a legal block) when hw is not a multiple of 128."""
    if hw % 128 != 0:
        return hw
    max_lanes = max(128, (max_block_bytes // (4 * c)) // 128 * 128)
    best = 128
    t = 128
    while t <= hw and t <= max_lanes:
        if hw % t == 0:
            best = t
        t += 128
    return best


def running_mean_and_var_forward(x_nchw, run_mean, run_var, run_count):
    """Training-mode forward of RunningMeanAndVar.

    Args:
      x_nchw:    (N, C, H, W) float32
      run_mean:  (1, C, 1, 1) float32  running mean buffer
      run_var:   (1, C, 1, 1) float32  running var buffer
      run_count: ()           float32  running count buffer

    Returns:
      y (N, C, H, W), updated (mean, var, count) buffers with the same shapes.
    """
    n, c, h, w = x_nchw.shape
    hw = h * w

    # NCHW -> (N, C, H*W): free reshape (trailing-dim collapse), no transpose.
    x3 = x_nchw.reshape(n, c, hw).astype(jnp.float32)
    mean_c = run_mean.reshape(c, 1).astype(jnp.float32)
    var_c = run_var.reshape(c, 1).astype(jnp.float32)
    count_c = run_count.reshape(1).astype(jnp.float32)

    hw_tile = _pick_hw_tile(hw, c)
    n_hw_tiles = hw // hw_tile

    x_spec = pl.BlockSpec((pl.Squeezed(), c, hw_tile), lambda i, j: (i, 0, j))
    stat_spec = pl.BlockSpec((c, 1), lambda i, j: (0, 0))
    smem_spec = pl.BlockSpec(memory_space=pltpu.MemorySpace.SMEM)

    # ---- Pass 1: per-channel batch stats + merge with the running buffers ----
    mean_u, var_u, inv_std = pl.pallas_call(
        functools.partial(
            _reduce_stats_kernel,
            tile_elems=float(hw_tile),
            total_elems=float(n * hw),
            n_batch=float(n),
        ),
        grid=(n, n_hw_tiles),
        in_specs=[x_spec, stat_spec, stat_spec, smem_spec],
        out_specs=(stat_spec, stat_spec, stat_spec),
        out_shape=(
            jax.ShapeDtypeStruct((c, 1), jnp.float32),
            jax.ShapeDtypeStruct((c, 1), jnp.float32),
            jax.ShapeDtypeStruct((c, 1), jnp.float32),
        ),
        scratch_shapes=[
            pltpu.VMEM((c, 1), jnp.float32),
            pltpu.VMEM((c, 1), jnp.float32),
        ],
        compiler_params=pltpu.CompilerParams(
            dimension_semantics=("arbitrary", "arbitrary")),
    )(x3, mean_c, var_c, count_c)

    # ---- Pass 2: normalize with the updated running stats ----
    y3 = pl.pallas_call(
        _normalize_kernel,
        grid=(n, n_hw_tiles),
        in_specs=[x_spec, stat_spec, stat_spec],
        out_specs=x_spec,
        out_shape=jax.ShapeDtypeStruct((n, c, hw), jnp.float32),
        compiler_params=pltpu.CompilerParams(
            dimension_semantics=("parallel", "parallel")),
    )(x3, mean_u, inv_std)

    y = y3.reshape(n, c, h, w)
    new_mean = mean_u.reshape(1, c, 1, 1)
    new_var = var_u.reshape(1, c, 1, 1)
    new_count = (run_count.astype(jnp.float32) + jnp.float32(n)).reshape(())
    return y, new_mean, new_var, new_count


def _reference_forward(x, mean, var, count):
    """Pure-JAX reference matching the PyTorch module (training, non-distributed)."""
    n = x.shape[0]
    new_count = jnp.float32(n)
    new_mean = jnp.mean(x, axis=(2, 3), keepdims=True).sum(0, keepdims=True) / new_count
    new_var = jnp.mean((x - new_mean) ** 2, axis=(2, 3), keepdims=True).sum(
        0, keepdims=True) / new_count
    m_a = var * count
    m_b = new_var * new_count
    m2 = m_a + m_b + (new_mean - mean) ** 2 * count * new_count / (count + new_count)
    var_u = m2 / (count + new_count)
    mean_u = (count * mean + new_count * new_mean) / (count + new_count)
    count_u = count + new_count
    stdev = jnp.sqrt(jnp.maximum(var_u, 0.01))
    return (x - mean_u) / stdev, mean_u, var_u, count_u


if __name__ == "__main__":
    N, C, H, W = 2, 4, 16, 16

    key = jax.random.PRNGKey(0)
    x = jax.random.normal(key, (N, C, H, W), dtype=jnp.float32) * 2.0 + 0.5

    # Buffers as in nn.Module.__init__ (deterministic zeros).
    run_mean = jnp.zeros((1, C, 1, 1), jnp.float32)
    run_var = jnp.zeros((1, C, 1, 1), jnp.float32)
    run_count = jnp.zeros((), jnp.float32)

    y, nm, nv, nc = running_mean_and_var_forward(x, run_mean, run_var, run_count)
    jax.block_until_ready((y, nm, nv, nc))

    y_ref, nm_ref, nv_ref, nc_ref = _reference_forward(x, run_mean, run_var, run_count)
    assert jnp.allclose(y, y_ref, atol=1e-5, rtol=1e-5)
    assert jnp.allclose(nm, nm_ref, atol=1e-5, rtol=1e-5)
    assert jnp.allclose(nv, nv_ref, atol=1e-5, rtol=1e-5)
    assert jnp.allclose(nc, nc_ref)

    print("KERNEL_OK")
</pallas_src>

<mosaic_0001>
module attributes {stable_mosaic.version = 11 : i64} {
  func.func @_reduce_stats_kernel(%arg0: i32, %arg1: i32, %arg2: memref<1x4x256xf32, #tpu.memory_space<vmem>>, %arg3: memref<4x1xf32, #tpu.memory_space<vmem>>, %arg4: memref<4x1xf32, #tpu.memory_space<vmem>>, %arg5: memref<1xf32, #tpu.memory_space<smem>>, %arg6: memref<4x1xf32, #tpu.memory_space<vmem>>, %arg7: memref<4x1xf32, #tpu.memory_space<vmem>>, %arg8: memref<4x1xf32, #tpu.memory_space<vmem>>, %arg9: memref<4x1xf32, #tpu.memory_space<vmem>>, %arg10: memref<4x1xf32, #tpu.memory_space<vmem>>) attributes {dimension_semantics = [#tpu.dimension_semantics<arbitrary>, #tpu.dimension_semantics<arbitrary>], iteration_bounds = array<i64: 2, 1>, scalar_prefetch = 0 : i64, scratch_operands = 2 : i64, tpu.core_type = #tpu.core_type<tc>, window_params = [{transform_indices = @transform_0, window_bounds = array<i64: 1, 4, 256>}, {pipeline_mode = #tpu.pipeline_mode<synchronous>, transform_indices = @transform_1, window_bounds = array<i64: 4, 1>}, {pipeline_mode = #tpu.pipeline_mode<synchronous>, transform_indices = @transform_2, window_bounds = array<i64: 4, 1>}, {transform_indices = @transform_3, window_bounds = array<i64: 1>}, {pipeline_mode = #tpu.pipeline_mode<synchronous>, transform_indices = @transform_4, window_bounds = array<i64: 4, 1>}, {pipeline_mode = #tpu.pipeline_mode<synchronous>, transform_indices = @transform_5, window_bounds = array<i64: 4, 1>}, {pipeline_mode = #tpu.pipeline_mode<synchronous>, transform_indices = @transform_6, window_bounds = array<i64: 4, 1>}]} {
    %c1_i32 = arith.constant 1 : i32
    %0 = arith.muli %arg0, %c1_i32 : i32
    %1 = arith.addi %0, %arg1 : i32
    %c0_i32 = arith.constant 0 : i32
    %2 = arith.cmpi eq, %1, %c0_i32 : i32
    %3 = arith.extui %2 : i1 to i32
    %c0_i32_0 = arith.constant 0 : i32
    %4 = arith.cmpi ne, %3, %c0_i32_0 : i32
    scf.if %4 {
      %cst_21 = arith.constant 0.000000e+00 : f32
      %39 = vector.broadcast %cst_21 : f32 to vector<4x1xf32>
      %c0_22 = arith.constant 0 : index
      %c0_23 = arith.constant 0 : index
      %40 = vector.load %arg9[%c0_22, %c0_23] : memref<4x1xf32, #tpu.memory_space<vmem>>, vector<4x1xf32>
      tpu.vector_store %arg9[%c0_22, %c0_23], %39 {strides = array<i32>} : memref<4x1xf32, #tpu.memory_space<vmem>>, vector<4x1xf32>,
      %cst_24 = arith.constant 0.000000e+00 : f32
      %41 = vector.broadcast %cst_24 : f32 to vector<4x1xf32>
      %c0_25 = arith.constant 0 : index
      %c0_26 = arith.constant 0 : index
      %42 = vector.load %arg10[%c0_25, %c0_26] : memref<4x1xf32, #tpu.memory_space<vmem>>, vector<4x1xf32>
      tpu.vector_store %arg10[%c0_25, %c0_26], %41 {strides = array<i32>} : memref<4x1xf32, #tpu.memory_space<vmem>>, vector<4x1xf32>,
    } else {
    }
    %c0 = arith.constant 0 : index
    %c0_1 = arith.constant 0 : index
    %c0_2 = arith.constant 0 : index
    %5 = vector.load %arg2[%c0, %c0_1, %c0_2] : memref<1x4x256xf32, #tpu.memory_space<vmem>>, vector<1x4x256xf32>
    %6 = vector.shape_cast %5 : vector<1x4x256xf32> to vector<4x256xf32>
    %cst = arith.constant dense<0.000000e+00> : vector<4xf32>
    %7 = vector.multi_reduction <add>, %6, %cst [1] : vector<4x256xf32> to vector<4xf32>
    %8 = vector.shape_cast %7 : vector<4xf32> to vector<4x1xf32>
    %cst_3 = arith.constant 2.560000e+02 : f32
    %9 = vector.broadcast %cst_3 : f32 to vector<4x1xf32>
    %10 = arith.divf %8, %9 : vector<4x1xf32>
    %11 = vector.broadcast %10 : vector<4x1xf32> to vector<4x256xf32>
    %12 = arith.subf %6, %11 : vector<4x256xf32>
    %13 = arith.mulf %12, %12 : vector<4x256xf32>
    %cst_4 = arith.constant dense<0.000000e+00> : vector<4xf32>
    %14 = vector.multi_reduction <add>, %13, %cst_4 [1] : vector<4x256xf32> to vector<4xf32>
    %15 = vector.shape_cast %14 : vector<4xf32> to vector<4x1xf32>
    %16 = arith.sitofp %1 : i32 to f32
    %cst_5 = arith.constant 2.560000e+02 : f32
    %17 = arith.mulf %16, %cst_5 : f32
    %cst_6 = arith.constant 2.560000e+02 : f32
    %18 = arith.addf %17, %cst_6 : f32
    %c0_7 = arith.constant 0 : index
    %c0_8 = arith.constant 0 : index
    %19 = vector.load %arg9[%c0_7, %c0_8] : memref<4x1xf32, #tpu.memory_space<vmem>>, vector<4x1xf32>
    %20 = arith.subf %10, %19 : vector<4x1xf32>
    %c0_9 = arith.constant 0 : index
    %c0_10 = arith.constant 0 : index
    %21 = vector.load %arg10[%c0_9, %c0_10] : memref<4x1xf32, #tpu.memory_space<vmem>>, vector<4x1xf32>
    %22 = arith.addf %21, %15 : vector<4x1xf32>
    %23 = arith.mulf %20, %20 : vector<4x1xf32>
    %cst_11 = arith.constant 2.560000e+02 : f32
    %24 = arith.mulf %17, %cst_11 : f32
    %25 = arith.divf %24, %18 : f32
    %26 = vector.broadcast %25 : f32 to vector<4x1xf32>
    %27 = arith.mulf %23, %26 : vector<4x1xf32>
    %28 = arith.addf %22, %27 : vector<4x1xf32>
    %c0_12 = arith.constant 0 : index
    %c0_13 = arith.constant 0 : index
    %29 = vector.load %arg10[%c0_12, %c0_13] : memref<4x1xf32, #tpu.memory_space<vmem>>, vector<4x1xf32>
    tpu.vector_store %arg10[%c0_12, %c0_13], %28 {strides = array<i32>} : memref<4x1xf32, #tpu.memory_space<vmem>>, vector<4x1xf32>,
    %c0_14 = arith.constant 0 : index
    %c0_15 = arith.constant 0 : index
    %30 = vector.load %arg9[%c0_14, %c0_15] : memref<4x1xf32, #tpu.memory_space<vmem>>, vector<4x1xf32>
    %cst_16 = arith.constant 2.560000e+02 : f32
    %31 = arith.divf %cst_16, %18 : f32
    %32 = vector.broadcast %31 : f32 to vector<4x1xf32>
    %33 = arith.mulf %20, %32 : vector<4x1xf32>
    %34 = arith.addf %30, %33 : vector<4x1xf32>
    %c0_17 = arith.constant 0 : index
    %c0_18 = arith.constant 0 : index
    %35 = vector.load %arg9[%c0_17, %c0_18] : memref<4x1xf32, #tpu.memory_space<vmem>>, vector<4x1xf32>
    tpu.vector_store %arg9[%c0_17, %c0_18], %34 {strides = array<i32>} : memref<4x1xf32, #tpu.memory_space<vmem>>, vector<4x1xf32>,
    %c1_i32_19 = arith.constant 1 : i32
    %36 = arith.cmpi eq, %1, %c1_i32_19 : i32
    %37 = arith.extui %36 : i1 to i32
    %c0_i32_20 = arith.constant 0 : i32
    %38 = arith.cmpi ne, %37, %c0_i32_20 : i32
    scf.if %38 {
      %c0_21 = arith.constant 0 : index
      %c0_22 = arith.constant 0 : index
      %39 = vector.load %arg9[%c0_21, %c0_22] : memref<4x1xf32, #tpu.memory_space<vmem>>, vector<4x1xf32>
      %c0_23 = arith.constant 0 : index
      %c0_24 = arith.constant 0 : index
      %40 = vector.load %arg10[%c0_23, %c0_24] : memref<4x1xf32, #tpu.memory_space<vmem>>, vector<4x1xf32>
      %cst_25 = arith.constant 5.120000e+02 : f32
      %41 = vector.broadcast %cst_25 : f32 to vector<4x1xf32>
      %42 = arith.divf %40, %41 : vector<4x1xf32>
      %c0_26 = arith.constant 0 : index
      %43 = memref.load %arg5[%c0_26] : memref<1xf32, #tpu.memory_space<smem>>
      %cst_27 = arith.constant 2.000000e+00 : f32
      %44 = arith.addf %43, %cst_27 : f32
      %c0_28 = arith.constant 0 : index
      %c0_29 = arith.constant 0 : index
      %45 = vector.load %arg4[%c0_28, %c0_29] : memref<4x1xf32, #tpu.memory_space<vmem>>, vector<4x1xf32>
      %46 = vector.broadcast %43 : f32 to vector<4x1xf32>
      %47 = arith.mulf %45, %46 : vector<4x1xf32>
      %cst_30 = arith.constant 2.000000e+00 : f32
      %48 = vector.broadcast %cst_30 : f32 to vector<4x1xf32>
      %49 = arith.mulf %42, %48 : vector<4x1xf32>
      %c0_31 = arith.constant 0 : index
      %c0_32 = arith.constant 0 : index
      %50 = vector.load %arg3[%c0_31, %c0_32] : memref<4x1xf32, #tpu.memory_space<vmem>>, vector<4x1xf32>
      %51 = arith.subf %39, %50 : vector<4x1xf32>
      %52 = arith.addf %47, %49 : vector<4x1xf32>
      %53 = arith.mulf %51, %51 : vector<4x1xf32>
      %cst_33 = arith.constant 2.000000e+00 : f32
      %54 = arith.mulf %43, %cst_33 : f32
      %55 = arith.divf %54, %44 : f32
      %56 = vector.broadcast %55 : f32 to vector<4x1xf32>
      %57 = arith.mulf %53, %56 : vector<4x1xf32>
      %58 = arith.addf %52, %57 : vector<4x1xf32>
      %59 = vector.broadcast %44 : f32 to vector<4x1xf32>
      %60 = arith.divf %58, %59 : vector<4x1xf32>
      %c0_34 = arith.constant 0 : index
      %c0_35 = arith.constant 0 : index
      %61 = vector.load %arg3[%c0_34, %c0_35] : memref<4x1xf32, #tpu.memory_space<vmem>>, vector<4x1xf32>
      %62 = vector.broadcast %43 : f32 to vector<4x1xf32>
      %63 = arith.mulf %62, %61 : vector<4x1xf32>
      %cst_36 = arith.constant 2.000000e+00 : f32
      %64 = vector.broadcast %cst_36 : f32 to vector<4x1xf32>
      %65 = arith.mulf %64, %39 : vector<4x1xf32>
      %66 = arith.addf %63, %65 : vector<4x1xf32>
      %67 = vector.broadcast %44 : f32 to vector<4x1xf32>
      %68 = arith.divf %66, %67 : vector<4x1xf32>
      %c0_37 = arith.constant 0 : index
      %c0_38 = arith.constant 0 : index
      %69 = vector.load %arg6[%c0_37, %c0_38] : memref<4x1xf32, #tpu.memory_space<vmem>>, vector<4x1xf32>
      tpu.vector_store %arg6[%c0_37, %c0_38], %68 {strides = array<i32>} : memref<4x1xf32, #tpu.memory_space<vmem>>, vector<4x1xf32>,
      %c0_39 = arith.constant 0 : index
      %c0_40 = arith.constant 0 : index
      %70 = vector.load %arg7[%c0_39, %c0_40] : memref<4x1xf32, #tpu.memory_space<vmem>>, vector<4x1xf32>
      tpu.vector_store %arg7[%c0_39, %c0_40], %60 {strides = array<i32>} : memref<4x1xf32, #tpu.memory_space<vmem>>, vector<4x1xf32>,
      %cst_41 = arith.constant 0.00999999977 : f32
      %71 = vector.broadcast %cst_41 : f32 to vector<4x1xf32>
      %72 = arith.maximumf %60, %71 : vector<4x1xf32>
      %73 = math.rsqrt %72 : vector<4x1xf32>
      %c0_42 = arith.constant 0 : index
      %c0_43 = arith.constant 0 : index
      %74 = vector.load %arg8[%c0_42, %c0_43] : memref<4x1xf32, #tpu.memory_space<vmem>>, vector<4x1xf32>
      tpu.vector_store %arg8[%c0_42, %c0_43], %73 {strides = array<i32>} : memref<4x1xf32, #tpu.memory_space<vmem>>, vector<4x1xf32>,
    } else {
    }
    return
  }
  func.func @transform_0(%arg0: i32, %arg1: i32) -> (i32, i32, i32) {
    %c0_i32 = arith.constant 0 : i32
    %c0_i32_0 = arith.constant 0 : i32
    return %arg0, %c0_i32, %arg1 : i32, i32, i32
  }
  func.func @transform_1(%arg0: i32, %arg1: i32) -> (i32, i32) {
    %c0_i32 = arith.constant 0 : i32
    %c0_i32_0 = arith.constant 0 : i32
    %c0_i32_1 = arith.constant 0 : i32
    return %c0_i32, %c0_i32_0 : i32, i32
  }
  func.func @transform_2(%arg0: i32, %arg1: i32) -> (i32, i32) {
    %c0_i32 = arith.constant 0 : i32
    %c0_i32_0 = arith.constant 0 : i32
    %c0_i32_1 = arith.constant 0 : i32
    return %c0_i32, %c0_i32_0 : i32, i32
  }
  func.func @transform_3(%arg0: i32, %arg1: i32) -> i32 {
    %c0_i32 = arith.constant 0 : i32
    %c0_i32_0 = arith.constant 0 : i32
    return %c0_i32 : i32
  }
  func.func @transform_4(%arg0: i32, %arg1: i32) -> (i32, i32) {
    %c0_i32 = arith.constant 0 : i32
    %c0_i32_0 = arith.constant 0 : i32
    %c0_i32_1 = arith.constant 0 : i32
    return %c0_i32, %c0_i32_0 : i32, i32
  }
  func.func @transform_5(%arg0: i32, %arg1: i32) -> (i32, i32) {
    %c0_i32 = arith.constant 0 : i32
    %c0_i32_0 = arith.constant 0 : i32
    %c0_i32_1 = arith.constant 0 : i32
    return %c0_i32, %c0_i32_0 : i32, i32
  }
  func.func @transform_6(%arg0: i32, %arg1: i32) -> (i32, i32) {
    %c0_i32 = arith.constant 0 : i32
    %c0_i32_0 = arith.constant 0 : i32
    %c0_i32_1 = arith.constant 0 : i32
    return %c0_i32, %c0_i32_0 : i32, i32
  }
}

</mosaic_0001>

<bundles_post_ra>
// kernel: tpu_custom_call.1
= control target key start
LH: loop header
LB: loop body
LE: loop exit
PB: predicated region body
PF: predicated region fallthrough
CT: control target
= control target key end

     0   :  { %s786_s0 = inlined_call_operand.hbm [shape: f32[2,4,256], index: 0, kind: input, shape index: {}]   ;;  %s787_s1 = inlined_call_operand.vmem [shape: f32[4,1], index: 1, kind: input, shape index: {}]   ;;  %s788_s2 = inlined_call_operand.vmem [shape: f32[4,1], index: 2, kind: input, shape index: {}]   ;;  %s789_s3 = inlined_call_operand.<no memory space> [shape: f32[1], index: 3, kind: input, shape index: {}]   ;;  %s790_s4 = inlined_call_operand.vmem [shape: f32[4,1], index: 4, kind: output, shape index: {0}]   ;;  %s791_s5 = inlined_call_operand.vmem [shape: f32[4,1], index: 5, kind: output, shape index: {1}]   ;;  %s792_s6 = inlined_call_operand.vmem [shape: f32[4,1], index: 6, kind: output, shape index: {2}]  }
   0x1   :  { %12 = sst [smem:[#allocation4]] %s789_s3 }
   0x2   :  { %13 = vsyncpa [#allocation6], 0 }
   0x3   :  { %15 = vsyncpa [#allocation6 + $0x1], 0  ;;  %s639_s23 = smov 0   ;;  %s641_s24 = smov 0  }
   0x4   :  { %s643_s25 = smov 0   ;;  %s645_s26 = smov 0  }
   0x5   :  { %s647_s27 = smov 0   ;;  %s649_s28 = smov 0  }
   0x6 LB: > { %s435_s3 = sadd.s32 4294967295, %s596_s28   ;;  %s33_s29 = sadd.s32 1, %s592_s27  ;;  %s596_s28 = sphi %s649_s28, %s21_s28   ;;  %s592_s27 = sphi %s647_s27, %s802_s27   ;;  %s588_s26 = sphi %s645_s26, %s801_s26   ;;  %s584_s25 = sphi %s643_s25, %s800_s25   ;;  %s580_s24 = sphi %s641_s24, %s799_s24   ;;  %s576_s23 = sphi %s639_s23, %s798_s23  }
   0x7   : > { %p35_p0 = scmp.ge.s32.totalorder %s33_s29, 2  ;;  %s42_s30 = sadd.s32 1, %s584_s25 }
   0x8   : > { %p49_p1 = scmp.ne.s32.totalorder %s584_s25, %s580_s24  ;;  %p50_p2 = scmp.eq.s32.totalorder %s596_s28, 0 }
   0x9   : > { %s804_s29 = smov (%p35_p0, %s33_s29), 0  ;;  %p55_p4 = scmp.ne.s32.totalorder %s580_s24, %s576_s23 }
   0xa   : > { %p675_p3 = por %p50_p2, %p49_p1  ;;  %s37_s8 = ssub.s32 %s592_s27, %s804_s29 }
   0xb   : > { %p56_p5 = scmp.eq.s32.totalorder %s435_s3, 0  ;;  %p40_p6 = scmp.eq.s32.totalorder %s37_s8, 0 }
   0xc   : > { %p458_p8 = scmp.lt.s32.totalorder %s596_s28, 2  ;;  %s214_s11 = sand.u32 1, %s584_s25  }
   0xd   : > { %p682_p7 = por %p56_p5, %p55_p4  ;;  %s447_s12 = sshll.u32 %s592_s27, 7 }
   0xe   : > { %s688_s10 = scalar_select %p40_p6, %s584_s25, %s42_s30  }
   0xf   : > { %s438_s13 = sshll.u32 %s214_s11, 3  ;;  %s695_s16 = scalar_lea.hbm %s786_s0, %s447_s12 }
  0x10   : > { %s218_s17 = scalar_lea.vmem [#allocation5], %s438_s13  ;;  %p699_p9 = pnand %p458_p8, %p675_p3 }
  0x11   : > { %s228_s18 = sshll.u32 %s218_s17, 4  ;;  %s215_s20 = scalar_lea.sflag [#allocation6], %s214_s11  ;;  %s703_s18 = int_to_ptr.vmem [resolvable:$true] %s228_s18 }
  0x12   : > { %s516_s21 = scalar_lea.hbm %s695_s16, 128  ;;  %p518_p13 = pneg %p699_p9 }
  0x13   : > { %p517_p12 = scmp.ne.s32.totalorder %s695_s16, %s516_s21  ;;  %s521_s3 = scalar_lea.hbm %s786_s0, 256 }
  0x14   : > { %p522_p2 = scmp.lt.u32.totalorder %s695_s16, %s786_s0  ;;  %p523_p3 = scmp.lt.u32.totalorder %s521_s3, %s516_s21 }
  0x15   : > { %p519_p0 = pnand %p518_p13, %p517_p12  ;;  %p525_p5 = scmp.lt.u32.totalorder %s516_s21, %s695_s16 }
  0x16   : > { %p524_p4 = por %p523_p3, %p522_p2 }
  0x17   : > { %p520_p1 = pneg %p519_p0 }
  0x18   : > { %p526_p6 = por %p525_p5, %p524_p4 }
  0x1a   : > { %p527_p8 = pnand %p526_p6, %p520_p1 }
  0x1c   : > { %530 = shalt.err (!%p527_p8)
}
  0x1d   : > { %s531_s8 = scalar_lea.vmem %s703_s18, 128  ;;  %s598_s11 = smov [#allocation5]  }
  0x1e   : > { %p532_p12 = scmp.ne.s32.totalorder %s703_s18, %s531_s8  ;;  %s536_s12 = sshll.u32 %s598_s11, 4  ;;  %s537_s12 = int_to_ptr.vmem [resolvable:$false] %s536_s12 }
  0x1f   : > { %s538_s13 = scalar_lea.vmem %s537_s12, 256  ;;  %p539_p11 = scmp.lt.s32.totalorder %s703_s18, %s537_s12 }
  0x20   : > { %p534_p0 = pnand %p532_p12, %p518_p13  ;;  %p540_p2 = scmp.lt.s32.totalorder %s538_s13, %s531_s8 }
  0x22   : > { %p535_p10 = pneg %p534_p0  ;;  %p541_p3 = por %p540_p2, %p539_p11 }
  0x24   : > { %p542_p4 = pnand %p541_p3, %p535_p10 }
  0x26   : > { %545 = shalt.err (!%p542_p4)
}
  0x27   : > { %457 = dma.hbm_to_vmem [thread:$0]  (!%p699_p9), %s695_s16, 128, %s703_s18, %s215_s20  }
  0x28   : > { %p796_p1 = scmp.lt.s32.totalorder %s596_s28, 3  ;;  %p797_p5 = scmp.ge.s32.totalorder %s596_s28, 1 }
  0x2a   : > { %p234_p13 = pnand %p797_p5, %p796_p1 }
  0x2b   : > { %s239_s14 = sand.u32 (!%p234_p13), 1, %s580_s24  }
  0x2c   : > { %237 = sbr.rel (%p234_p13) target bundleno = 400 (0x190), region = 36  ;;  %s442_s15 = sshll.u32 (!%p234_p13), %s239_s14, 3 }
  0x2d   : > { %s240_s17 = scalar_lea.sflag (!%p234_p13), [#allocation6], %s239_s14  ;;  %s243_s21 = scalar_lea.vmem (!%p234_p13), [#allocation5], %s442_s15 }
  0x33   : > { %571 = dma.done.wait (%p682_p7), %s240_s17, 128  }
  0x34   : > { %573 = vsyncadd (%p682_p7), %s240_s17, 4294967168  ;;  %p443_p10 = scmp.ne.s32.totalorder %s588_s26, 0 }
  0x35   : > { %vm273_vm0 = vcmask (!%p443_p10), 3072   ;;  %v599_v0 = vmov (!%p443_p10), 0.0  }
  0x36   : > { %272 = sbr.rel (%p443_p10) target bundleno = 61 (0x3d), region = 44  ;;  %274 = vst.msk [vmem:[#allocation2] sm:$0xf] (!%p443_p10), %vm273_vm0, %v599_v0  ;;  %275 = vst.msk [vmem:[#allocation3] sm:$0xf] (!%p443_p10), %vm273_vm0, %v599_v0 }
  0x3d PF: > { %v276_v1 = vld [vmem:[%s243_s21] sm:$0xff]  ;;  %vm280_vm1 = vcmask 1043456   ;;  %s307_s16 = scvt.s32.f32 %s588_s26  ;;  %v600_v8 = vmov 839922192   ;;  %v292_v10 = vlaneseq  ;;  %v310_v14 = vld [vmem:[#allocation2] sm:$0xf] }
  0x3e   : > { %v278_v2 = vcombine.high %v276_v1, %v276_v1  ;;  %v281_v3 = vsel %vm280_vm1, %v276_v1, 0.0  ;;  %v290_v9 = vunpack.c.l.s4 %v600_v8  ;;  %v325_v21 = vld [vmem:[#allocation2] sm:$0xf]  ;;  %vm323_vm2 = vcmask 3072   ;;  %v312_v32 = vld [vmem:[#allocation3] sm:$0xf] }
  0x3f   : > { %s308_s18 = smul.f32 256.0, %s307_s16  ;;  %v293_v12 = vshrl.u32 %v292_v10, 7  ;;  %p444_p7 = scmp.ne.s32.totalorder %s588_s26, 1 }
  0x40   : > { %v282_v4 = vsel %vm280_vm1, %v278_v2, 0.0  ;;  %v291_v11 = vunpack.c.0.s8 %v290_v9  ;;  %s342_s3 = sld [smem:[#allocation4]] (!%p444_p7)  ;;  %v348_v39 = vld [vmem:[%s787_s1] sm:$0xf] (!%p444_p7) }
  0x41   : > { %v283_v5 = vadd.f32 %v282_v4, %v281_v3  ;;  %s309_s9 = sadd.f32 256.0, %s308_s18  ;;  %s315_s19 = smul.f32 256.0, %s308_s18  ;;  %v344_v47 = vld [vmem:[%s788_s2] sm:$0xf] (!%p444_p7) }
  0x42   : > { %v294_v13 = vsub.s32 %v291_v11, %v293_v12 }
  0x43   : > { %284 = vadd.xlane.f32.xlu0 %v283_v5  ;;  %v316_v6 = vstv %s309_s9 }
  0x44   : > { %510 = vrcp.f32 %v316_v6 }
  0x46   : > { %s343_s30 = sadd.f32 (!%p444_p7), 2.0, %s342_s3  ;;  %v345_v38 = vstv (!%p444_p7), %s342_s3  ;;  %s352_s14 = smul.f32 (!%p444_p7), 2.0, %s342_s3 }
  0x47   : > { %v363_v40 = vmul.f32 (!%p444_p7), %v348_v39, %v345_v38  ;;  %v346_v49 = vmul.f32 (!%p444_p7), %v345_v38, %v344_v47 }
  0x48   : > { %v353_v36 = vstv (!%p444_p7), %s343_s30 }
  0x49   : > { %512 = vrcp.f32 (!%p444_p7), %v353_v36 }
  0x4e   : > { %v511_v7 = vpop.eup %510 }
  0x4f   : > { %448 = vpush %v511_v7 }
  0x53   : > { %v513_v43 = vpop.eup (!%p444_p7), %512 }
  0x54   : > { %450 = vpush (!%p444_p7), %v513_v43 }
  0x80   : > { %s449_s20 = spop %448 }
  0x81   : > { %s319_s22 = smul.f32 %s449_s20, %s315_s19 }
  0x82   : > { %s329_s23 = smul.f32 256.0, %s449_s20 }
  0x83   : > { %v320_v20 = vstv %s319_s22 }
  0x84   : > { %v330_v17 = vstv %s329_s23 }
  0x85   : > { %s451_s15 = spop (!%p444_p7), %450 }
  0x86   : > { %s356_s17 = smul.f32 (!%p444_p7), %s451_s15, %s352_s14 }
  0x88   : > { %v357_v53 = vstv (!%p444_p7), %s356_s17 }
  0xd0   : > { %v285_v15 = vpop.xlane.xlu0 %284 }
  0xd1   : > { %v287_v16 = vmul.f32 0.00390625, %v285_v15 }
  0xd3   : > { %v295_v18 = vrot.slane %v287_v16, %v294_v13  ;;  %v311_v19 = vsub.f32 %v287_v16, %v310_v14 }
  0xd5   : > { %v297_v22 = vsub.f32 %v276_v1, %v295_v18  ;;  %v314_v23 = vmul.f32 %v311_v19, %v311_v19  ;;  %v331_v24 = vmul.f32 %v330_v17, %v311_v19 }
  0xd7   : > { %v321_v25 = vmul.f32 %v320_v20, %v314_v23  ;;  %v332_v26 = vadd.f32 %v331_v24, %v325_v21  ;;  %v298_v27 = vmul.f32 %v297_v22, %v297_v22 }
  0xd9   : > { %v300_v28 = vcombine.high %v298_v27, %v298_v27  ;;  %333 = vst.msk [vmem:[#allocation2] sm:$0xf] %vm323_vm2, %v332_v26  ;;  %v302_v29 = vsel %vm280_vm1, %v298_v27, 0.0 }
  0xdb   : > { %v303_v30 = vsel %vm280_vm1, %v300_v28, 0.0 }
  0xdc   : > { %v304_v31 = vadd.f32 %v303_v30, %v302_v29 }
  0xde   : > { %305 = vadd.xlane.f32.xlu0 %v304_v31 }
  0xe0   : > { %v338_v37 = vld [vmem:[#allocation2] sm:$0xf] (!%p444_p7) }
  0xe1   : > { %v364_v41 = vmul.f32 (!%p444_p7), 2.0, %v338_v37  ;;  %v349_v48 = vsub.f32 (!%p444_p7), %v338_v37, %v348_v39 }
  0xe3   : > { %v365_v42 = vadd.f32 (!%p444_p7), %v364_v41, %v363_v40  ;;  %v351_v51 = vmul.f32 (!%p444_p7), %v349_v48, %v349_v48 }
  0xe5   : > { %v366_v44 = vmul.f32 (!%p444_p7), %v513_v43, %v365_v42  ;;  %v358_v54 = vmul.f32 (!%p444_p7), %v357_v53, %v351_v51 }
  0xe7   : > { %367 = vst.msk [vmem:[%s790_s4] sm:$0xf] (!%p444_p7), %vm323_vm2, %v366_v44 }
 0x16a   : > { %337 = sbr.rel (%p444_p7) target bundleno = 400 (0x190), region = 48 }
 0x16b   : > { %v306_v33 = vpop.xlane.xlu0 %305 }
 0x16c   : > { %v313_v34 = vadd.f32 %v312_v32, %v306_v33 }
 0x16e   : > { %v322_v35 = vadd.f32 %v321_v25, %v313_v34 }
 0x170   : > { %324 = vst.msk [vmem:[#allocation3] sm:$0xf] %vm323_vm2, %v322_v35 }
 0x177   : > { %v339_v45 = vld [vmem:[#allocation3] sm:$0xf] }
 0x178   : > { %v341_v46 = vmul.f32 0.001953125, %v339_v45 }
 0x17a   : > { %v347_v50 = vmul.f32 2.0, %v341_v46 }
 0x17c   : > { %v350_v52 = vadd.f32 %v347_v50, %v346_v49 }
 0x17e   : > { %v359_v55 = vadd.f32 %v358_v54, %v350_v52 }
 0x180   : > { %v362_v56 = vmul.f32 %v513_v43, %v359_v55 }
 0x182   : > { %368 = vst.msk [vmem:[%s791_s5] sm:$0xf] %vm323_vm2, %v362_v56  ;;  %v369_v57 = vmax.f32 %v362_v56, 0.01 }
 0x184   : > { %514 = vrsqrt.f32 %v369_v57 }
 0x18e   : > { %v515_v58 = vpop.eup %514 }
 0x18f   : > { %371 = vst.msk [vmem:[%s792_s6] sm:$0xf] %vm323_vm2, %v515_v58 }
 0x190 PF: > { %s21_s28 = sadd.s32 1, %s596_s28   ;;  %s798_s23 = smov %s580_s24 }
 0x191   : > { %p18_p9 = scmp.ge.s32.totalorder %s21_s28, 4   ;;  %s799_s24 = smov %s584_s25 }
 0x192   : > { %s800_s25 = smov %s688_s10  ;;  %s801_s26 = smov %s592_s27 }
 0x193   : > { %s802_s27 = smov %s804_s29  ;;  %20 = sbr.rel (!%p18_p9) target bundleno = 6 (0x6), region = 96 }
 0x19a   :  { %395 = vsyncpa [#allocation6], 1 }
 0x19b   :  { %397 = vsyncpa [#allocation6 + $0x1], 1 }

</bundles_post_ra>
